<compile_context>
chip_gen: v7x
topology: tpu7x:2x2x1
jax: 0.10.0
libtpu: 0.0.40
codegen_flags: <defaults>
</compile_context>

<pallas_src>
from functools import partial

import jax
import jax.numpy as jnp
from jax.experimental import pallas as pl
from jax.experimental.pallas import tpu as pltpu


def _round_up(x, m):
    return ((x + m - 1) // m) * m


def _vmem_config():
    """(vmem_limit_bytes, pipeline-buffer budget) derived from the chip's VMEM size."""
    cap = 128 * 1024 * 1024
    try:
        cap = int(getattr(pltpu.get_tpu_info(), "vmem_capacity_bytes", cap))
    except Exception:
        pass
    limit = min(cap // 2, 64 * 1024 * 1024)
    budget = (limit * 3) // 4
    return limit, budget


def _choose_tile_rows(c0, couts, budget_bytes):
    """Max point-rows per block so double-buffered blocks + intermediates fit VMEM."""
    lane = 128

    def lp(c):  # lane-padded f32/bf16 row width in elements
        return max(_round_up(c, lane), lane)

    c_last, c_max = couts[-1], max(couts)
    per_row = (2 * 2 * lp(c0)            # bf16 input block, double-buffered
               + 2 * 4 * lp(c_max)       # f32 intermediates (~2 live)
               + 4 * lp(c_last)          # f32 max accumulator scratch
               + 2 * 4 * lp(c_last))     # f32 output block, double-buffered
    rows = max(16, budget_bytes // per_row)
    return int(min(2048, (rows // 16) * 16))


def _pick_tiling(G, max_rows):
    """tile rows (mult. of 16) + padded G; keeps row-padding waste <= 25%."""
    t = min(max_rows, _round_up(G, 16))
    t = max(16, (t // 16) * 16)
    while t > 16:
        Gp = _round_up(G, t)
        if 4 * (Gp - G) <= Gp:
            return t, Gp
        t = max(16, ((t // 2) // 16) * 16)
    return 16, _round_up(G, 16)


# ----------------------------------------------------------------------------
# Pallas kernel: shared-MLP (BN-folded matmul + bias + ReLU) and running max
# over the nsample grid axis.  Points on sublanes, channels on lanes, so the
# small folded weight is the MXU-stationary RHS operand.
# ----------------------------------------------------------------------------
def _make_mlp_maxpool_kernel(num_layers):
    def kernel(*refs):
        x_ref = refs[0]                    # (tile_g, C0) bf16 -- one sample slice
        o_ref = refs[1 + 2 * num_layers]   # (tile_g, C_last) f32
        acc_ref = refs[2 + 2 * num_layers]  # VMEM scratch (tile_g, C_last) f32
        s = pl.program_id(2)

        h = x_ref[...]                     # bf16 activations, points on sublanes
        for l in range(num_layers):
            w = refs[1 + 2 * l][...]       # (Cin, Cout) bf16, BN scale folded in
            b = refs[2 + 2 * l][...]       # (1, Cout) f32
            h32 = jnp.dot(h, w, preferred_element_type=jnp.float32)  # W = stationary RHS
            h32 = jnp.maximum(h32 + b, 0.0)                          # f32 lane-splat bias + ReLU
            h = h32.astype(jnp.bfloat16) if l + 1 < num_layers else h32

        @pl.when(s == 0)
        def _():
            acc_ref[...] = h

        @pl.when(s > 0)
        def _():
            acc_ref[...] = jnp.maximum(acc_ref[...], h)

        @pl.when(s == pl.num_programs(2) - 1)
        def _():
            o_ref[...] = acc_ref[...].astype(o_ref.dtype)

    return kernel


def mlp_maxpool_pallas(x, layer_params, tile_g, vmem_limit):
    """x: (NG, S, Gp, C0) bf16 grouped features (points on sublanes, channels on lanes).
    layer_params: per layer (Wt (NG, Cin, Cout) bf16 with BN scale folded, b (NG, 1, Cout) f32).
    Returns (NG, Gp, C_last) f32: shared MLP + max-pool over the nsample axis."""
    NG, S, Gp, C0 = x.shape
    num_layers = len(layer_params)
    c_last = layer_params[-1][0].shape[2]
    assert Gp % tile_g == 0 and tile_g % 16 == 0

    in_specs = [pl.BlockSpec((None, None, tile_g, C0), lambda g, i, s: (g, s, i, 0))]
    operands = [x]
    for (wt, b) in layer_params:
        cin, cout = wt.shape[1], wt.shape[2]
        in_specs.append(pl.BlockSpec((None, cin, cout), lambda g, i, s: (g, 0, 0)))
        in_specs.append(pl.BlockSpec((None, 1, cout), lambda g, i, s: (g, 0, 0)))
        operands += [wt, b]

    flops = 2 * NG * S * Gp * sum(int(w.shape[1]) * int(w.shape[2])
                                  for (w, _) in layer_params)
    bytes_accessed = (x.size * 2
                      + sum(int(w.size) * 2 + int(b.size) * 4 for (w, b) in layer_params)
                      + NG * Gp * c_last * 4)

    return pl.pallas_call(
        _make_mlp_maxpool_kernel(num_layers),
        out_shape=jax.ShapeDtypeStruct((NG, Gp, c_last), jnp.float32),
        grid_spec=pltpu.PrefetchScalarGridSpec(
            num_scalar_prefetch=0,
            grid=(NG, Gp // tile_g, S),          # grouper, point-tile, nsample (reduction)
            in_specs=in_specs,
            out_specs=pl.BlockSpec((None, tile_g, c_last), lambda g, i, s: (g, i, 0)),
            scratch_shapes=[pltpu.VMEM((tile_g, c_last), jnp.float32)],
        ),
        compiler_params=pltpu.CompilerParams(
            dimension_semantics=("parallel", "parallel", "arbitrary"),
            vmem_limit_bytes=int(vmem_limit)),
        cost_estimate=pl.CostEstimate(
            flops=int(flops), transcendentals=0, bytes_accessed=int(bytes_accessed)),
    )(*operands)


# ----------------------------------------------------------------------------
# Plain-JAX glue: furthest point sampling, ball query, grouping.
# (data-dependent, scalar-heavy ops -- kept outside the Pallas hot path)
# ----------------------------------------------------------------------------
def furthest_point_sample(xyz, npoint):
    """xyz: (B, N, 3) -> (B, npoint) int32 indices (matches pcdet CUDA semantics)."""
    B, N, _ = xyz.shape

    def single(pts):
        dist = jnp.full((N,), 1e10, jnp.float32)
        idxs = jnp.zeros((npoint,), jnp.int32)

        def body(i, carry):
            idxs, dist, last = carry
            d = jnp.sum((pts - pts[last]) ** 2, axis=-1)
            dist = jnp.minimum(dist, d)
            nxt = jnp.argmax(dist).astype(jnp.int32)
            idxs = idxs.at[i].set(nxt)
            return idxs, dist, nxt

        idxs, _, _ = jax.lax.fori_loop(1, npoint, body, (idxs, dist, jnp.int32(0)))
        return idxs

    return jax.vmap(single)(xyz)


def ball_query(xyz, new_xyz, radius, nsample):
    """Up to `nsample` neighbours within `radius`; empty slots take the first hit."""
    N = xyz.shape[1]
    d2 = jnp.sum((new_xyz[:, :, None, :] - xyz[:, None, :, :]) ** 2, axis=-1)  # (B,P,N)
    mask = d2 < radius * radius
    key = jnp.where(mask, jnp.arange(N)[None, None, :], N)
    order = jnp.sort(key, axis=-1)[:, :, :nsample]                             # (B,P,S)
    first = order[:, :, :1]
    first = jnp.where(first < N, first, 0)
    idx = jnp.where(order < N, order, first)
    return idx.astype(jnp.int32)


def group_features(xyz, new_xyz, features, radii_sub, nsamples_sub):
    """Gather grouped features directly in the kernel layout: (NG, S, B*P, C0) bf16."""
    B = xyz.shape[0]
    P = new_xyz.shape[1]
    idx = jnp.stack([ball_query(xyz, new_xyz, r, s)
                     for r, s in zip(radii_sub, nsamples_sub)], axis=0)   # (NG,B,P,S)
    idx = idx.transpose(0, 3, 1, 2)                                       # (NG,S,B,P)
    bidx = jnp.arange(B)[None, None, :, None]
    gx = xyz[bidx, idx] - new_xyz[None, None]                             # (NG,S,B,P,3)
    if features is not None:
        gf = features[bidx, idx]                                          # (NG,S,B,P,C)
        g = jnp.concatenate([gx, gf], axis=-1)
    else:
        g = gx
    NG, S = g.shape[0], g.shape[1]
    return g.reshape(NG, S, B * P, g.shape[-1]).astype(jnp.bfloat16)


def _fold(plist):
    """Fold eval-mode BN scale into the 1x1-conv weight (bf16); keep bias in f32."""
    out = []
    for (w, scale, bias) in plist:
        wt = (w * scale).astype(jnp.bfloat16)              # (Cin, Cout)
        out.append((wt, bias.reshape(1, -1).astype(jnp.float32)))
    return out


# ----------------------------------------------------------------------------
# Module forward (equivalent to _PointnetSAModuleBase.forward, pool='max_pool')
# ----------------------------------------------------------------------------
@partial(jax.jit, static_argnames=("npoint", "radii", "nsamples"))
def pointnet_sa_forward(xyz, features, params, npoint, radii, nsamples):
    """Returns (new_xyz (B,npoint,3), new_features (B, sum(C_out_k), npoint))."""
    B, N, _ = xyz.shape
    fps_idx = furthest_point_sample(xyz, npoint)                    # (B,npoint)
    new_xyz = xyz[jnp.arange(B)[:, None], fps_idx]                  # (B,npoint,3)

    P = npoint
    G = B * P
    C0 = 3 + (features.shape[-1] if features is not None else 0)
    n_groupers = len(params)
    vmem_limit, vmem_budget = _vmem_config()

    layer_shapes = tuple(tuple(tuple(w.shape) for (w, _, _) in p) for p in params)
    fuse = len(set(nsamples)) == 1 and len(set(layer_shapes)) == 1

    def run(radii_sub, nsamples_sub, params_sub):
        grouped = group_features(xyz, new_xyz, features, radii_sub, nsamples_sub)  # (ng,S,G,C0)
        couts = [int(w.shape[1]) for (w, _, _) in params_sub[0]]
        tile_g, Gp = _pick_tiling(G, _choose_tile_rows(C0, couts, vmem_budget))
        x = jnp.pad(grouped, ((0, 0), (0, 0), (0, Gp - G), (0, 0)))
        folded = [_fold(p) for p in params_sub]
        ng, L = len(params_sub), len(params_sub[0])
        lp = [(jnp.stack([folded[g][l][0] for g in range(ng)], 0),
               jnp.stack([folded[g][l][1] for g in range(ng)], 0)) for l in range(L)]
        out = mlp_maxpool_pallas(x, lp, tile_g, vmem_limit)          # (ng, Gp, c_last)
        c_last = out.shape[-1]
        o = out[:, :G, :].reshape(ng, B, P, c_last)
        return [o[g].transpose(0, 2, 1) for g in range(ng)]          # (B, c_last, P)

    if fuse:
        feats = run(radii, nsamples, params)                          # one fused pallas_call
    else:
        feats = []
        for i in range(n_groupers):
            feats += run((radii[i],), (nsamples[i],), [params[i]])

    return new_xyz, jnp.concatenate(feats, axis=1)


# ----------------------------------------------------------------------------
# Deterministic parameter initialization (Conv2d 1x1 weights + eval-mode BatchNorm)
# ----------------------------------------------------------------------------
def init_mlp_params(key, mlp_spec, eps=1e-5):
    params = []
    for cin, cout in zip(mlp_spec[:-1], mlp_spec[1:]):
        key, k1, k2, k3, k4, k5 = jax.random.split(key, 6)
        w = jax.random.normal(k1, (cin, cout), jnp.float32) / jnp.sqrt(cin)
        gamma = 1.0 + 0.01 * jax.random.normal(k2, (1, cout), jnp.float32)
        beta = 0.01 * jax.random.normal(k3, (1, cout), jnp.float32)
        mean = 0.01 * jax.random.normal(k4, (1, cout), jnp.float32)
        var = 1.0 + 0.1 * jax.random.uniform(k5, (1, cout), jnp.float32)
        scale = gamma / jnp.sqrt(var + eps)          # fold eval-mode BN
        bias = beta - mean * scale
        params.append((w, scale, bias))
    return params, key


if __name__ == "__main__":
    B, N, C = 2, 64, 4
    npoint = 16
    radii = (0.5, 1.0)
    nsamples = (8, 8)
    mlps = [[3 + C, 16, 32], [3 + C, 16, 32]]        # MSG: two groupers, fused in one call

    key = jax.random.PRNGKey(0)
    key, kx, kf = jax.random.split(key, 3)
    xyz = jax.random.uniform(kx, (B, N, 3), jnp.float32)
    features = jax.random.normal(kf, (B, N, C), jnp.float32)

    params = []
    for spec in mlps:
        p, key = init_mlp_params(key, spec)
        params.append(p)

    new_xyz, new_features = pointnet_sa_forward(
        xyz, features, params, npoint, radii, nsamples)
    jax.block_until_ready((new_xyz, new_features))

    assert new_xyz.shape == (B, npoint, 3)
    assert new_features.shape == (B, sum(m[-1] for m in mlps), npoint)
    assert bool(jnp.all(jnp.isfinite(new_features)))
    print("KERNEL_OK")
</pallas_src>

<mosaic_0001>
module attributes {stable_mosaic.version = 11 : i64} {
  func.func @kernel(%arg0: i32, %arg1: i32, %arg2: i32, %arg3: memref<1x1x32x7xbf16, #tpu.memory_space<vmem>>, %arg4: memref<1x7x16xbf16, #tpu.memory_space<vmem>>, %arg5: memref<1x1x16xf32, #tpu.memory_space<vmem>>, %arg6: memref<1x16x32xbf16, #tpu.memory_space<vmem>>, %arg7: memref<1x1x32xf32, #tpu.memory_space<vmem>>, %arg8: memref<1x32x32xf32, #tpu.memory_space<vmem>>, %arg9: memref<32x32xf32, #tpu.memory_space<vmem>>) attributes {dimension_semantics = [#tpu.dimension_semantics<parallel>, #tpu.dimension_semantics<parallel>, #tpu.dimension_semantics<arbitrary>], iteration_bounds = array<i64: 2, 1, 8>, scalar_prefetch = 0 : i64, scratch_operands = 1 : i64, tpu.core_type = #tpu.core_type<tc>, window_params = [{transform_indices = @transform_0, window_bounds = array<i64: 1, 1, 32, 7>}, {transform_indices = @transform_1, window_bounds = array<i64: 1, 7, 16>}, {transform_indices = @transform_2, window_bounds = array<i64: 1, 1, 16>}, {transform_indices = @transform_3, window_bounds = array<i64: 1, 16, 32>}, {transform_indices = @transform_4, window_bounds = array<i64: 1, 1, 32>}, {transform_indices = @transform_5, window_bounds = array<i64: 1, 32, 32>}]} {
    %c0 = arith.constant 0 : index
    %c0_0 = arith.constant 0 : index
    %c0_1 = arith.constant 0 : index
    %c0_2 = arith.constant 0 : index
    %0 = vector.load %arg3[%c0, %c0_0, %c0_1, %c0_2] : memref<1x1x32x7xbf16, #tpu.memory_space<vmem>>, vector<1x1x32x7xbf16>
    %1 = vector.shape_cast %0 : vector<1x1x32x7xbf16> to vector<32x7xbf16>
    %c0_3 = arith.constant 0 : index
    %c0_4 = arith.constant 0 : index
    %c0_5 = arith.constant 0 : index
    %2 = vector.load %arg4[%c0_3, %c0_4, %c0_5] : memref<1x7x16xbf16, #tpu.memory_space<vmem>>, vector<1x7x16xbf16>
    %3 = vector.shape_cast %2 : vector<1x7x16xbf16> to vector<7x16xbf16>
    %c0_6 = arith.constant 0 : index
    %c0_7 = arith.constant 0 : index
    %c0_8 = arith.constant 0 : index
    %4 = vector.load %arg5[%c0_6, %c0_7, %c0_8] : memref<1x1x16xf32, #tpu.memory_space<vmem>>, vector<1x1x16xf32>
    %5 = vector.shape_cast %4 : vector<1x1x16xf32> to vector<1x16xf32>
    %cst = arith.constant dense<0.000000e+00> : vector<32x16xf32>
    %6 = tpu.matmul %1, %3, %cst {dimension_numbers = #tpu.dot_dimension_numbers<[1], [0], [0], [1], [0, 0, 1, 1], [], []>} : vector<32x7xbf16>, vector<7x16xbf16>, vector<32x16xf32> -> vector<32x16xf32>
    %7 = vector.broadcast %5 : vector<1x16xf32> to vector<32x16xf32>
    %8 = arith.addf %6, %7 : vector<32x16xf32>
    %cst_9 = arith.constant 0.000000e+00 : f32
    %9 = vector.broadcast %cst_9 : f32 to vector<32x16xf32>
    %10 = arith.maximumf %8, %9 : vector<32x16xf32>
    %11 = arith.truncf %10 : vector<32x16xf32> to vector<32x16xbf16>
    %c0_10 = arith.constant 0 : index
    %c0_11 = arith.constant 0 : index
    %c0_12 = arith.constant 0 : index
    %12 = vector.load %arg6[%c0_10, %c0_11, %c0_12] : memref<1x16x32xbf16, #tpu.memory_space<vmem>>, vector<1x16x32xbf16>
    %13 = vector.shape_cast %12 : vector<1x16x32xbf16> to vector<16x32xbf16>
    %c0_13 = arith.constant 0 : index
    %c0_14 = arith.constant 0 : index
    %c0_15 = arith.constant 0 : index
    %14 = vector.load %arg7[%c0_13, %c0_14, %c0_15] : memref<1x1x32xf32, #tpu.memory_space<vmem>>, vector<1x1x32xf32>
    %15 = vector.shape_cast %14 : vector<1x1x32xf32> to vector<1x32xf32>
    %cst_16 = arith.constant dense<0.000000e+00> : vector<32x32xf32>
    %16 = tpu.matmul %11, %13, %cst_16 {dimension_numbers = #tpu.dot_dimension_numbers<[1], [0], [0], [1], [0, 0, 1, 1], [], []>} : vector<32x16xbf16>, vector<16x32xbf16>, vector<32x32xf32> -> vector<32x32xf32>
    %17 = vector.broadcast %15 : vector<1x32xf32> to vector<32x32xf32>
    %18 = arith.addf %16, %17 : vector<32x32xf32>
    %cst_17 = arith.constant 0.000000e+00 : f32
    %19 = vector.broadcast %cst_17 : f32 to vector<32x32xf32>
    %20 = arith.maximumf %18, %19 : vector<32x32xf32>
    %c0_i32 = arith.constant 0 : i32
    %21 = arith.cmpi eq, %arg2, %c0_i32 : i32
    %22 = arith.extui %21 : i1 to i32
    %c0_i32_18 = arith.constant 0 : i32
    %23 = arith.cmpi ne, %22, %c0_i32_18 : i32
    scf.if %23 {
      %c0_22 = arith.constant 0 : index
      %c0_23 = arith.constant 0 : index
      %30 = vector.load %arg9[%c0_22, %c0_23] : memref<32x32xf32, #tpu.memory_space<vmem>>, vector<32x32xf32>
      tpu.vector_store %arg9[%c0_22, %c0_23], %20 {strides = array<i32>} : memref<32x32xf32, #tpu.memory_space<vmem>>, vector<32x32xf32>,
    } else {
    }
    %c0_i32_19 = arith.constant 0 : i32
    %24 = arith.cmpi sgt, %arg2, %c0_i32_19 : i32
    %25 = arith.extui %24 : i1 to i32
    %c0_i32_20 = arith.constant 0 : i32
    %26 = arith.cmpi ne, %25, %c0_i32_20 : i32
    scf.if %26 {
      %c0_22 = arith.constant 0 : index
      %c0_23 = arith.constant 0 : index
      %30 = vector.load %arg9[%c0_22, %c0_23] : memref<32x32xf32, #tpu.memory_space<vmem>>, vector<32x32xf32>
      %31 = arith.maximumf %30, %20 : vector<32x32xf32>
      %c0_24 = arith.constant 0 : index
      %c0_25 = arith.constant 0 : index
      %32 = vector.load %arg9[%c0_24, %c0_25] : memref<32x32xf32, #tpu.memory_space<vmem>>, vector<32x32xf32>
      tpu.vector_store %arg9[%c0_24, %c0_25], %31 {strides = array<i32>} : memref<32x32xf32, #tpu.memory_space<vmem>>, vector<32x32xf32>,
    } else {
    }
    %c7_i32 = arith.constant 7 : i32
    %27 = arith.cmpi eq, %arg2, %c7_i32 : i32
    %28 = arith.extui %27 : i1 to i32
    %c0_i32_21 = arith.constant 0 : i32
    %29 = arith.cmpi ne, %28, %c0_i32_21 : i32
    scf.if %29 {
      %c0_22 = arith.constant 0 : index
      %c0_23 = arith.constant 0 : index
      %30 = vector.load %arg9[%c0_22, %c0_23] : memref<32x32xf32, #tpu.memory_space<vmem>>, vector<32x32xf32>
      %c0_24 = arith.constant 0 : index
      %c0_25 = arith.constant 0 : index
      %c0_26 = arith.constant 0 : index
      %31 = vector.load %arg8[%c0_24, %c0_25, %c0_26] : memref<1x32x32xf32, #tpu.memory_space<vmem>>, vector<1x32x32xf32>
      %32 = vector.shape_cast %31 : vector<1x32x32xf32> to vector<32x32xf32>
      %33 = vector.shape_cast %30 : vector<32x32xf32> to vector<1x32x32xf32>
      tpu.vector_store %arg8[%c0_24, %c0_25, %c0_26], %33 {strides = array<i32>} : memref<1x32x32xf32, #tpu.memory_space<vmem>>, vector<1x32x32xf32>,
    } else {
    }
    return
  }
  func.func @transform_0(%arg0: i32, %arg1: i32, %arg2: i32) -> (i32, i32, i32, i32) {
    %c0_i32 = arith.constant 0 : i32
    %c0_i32_0 = arith.constant 0 : i32
    return %arg0, %arg2, %arg1, %c0_i32 : i32, i32, i32, i32
  }
  func.func @transform_1(%arg0: i32, %arg1: i32, %arg2: i32) -> (i32, i32, i32) {
    %c0_i32 = arith.constant 0 : i32
    %c0_i32_0 = arith.constant 0 : i32
    %c0_i32_1 = arith.constant 0 : i32
    return %arg0, %c0_i32, %c0_i32_0 : i32, i32, i32
  }
  func.func @transform_2(%arg0: i32, %arg1: i32, %arg2: i32) -> (i32, i32, i32) {
    %c0_i32 = arith.constant 0 : i32
    %c0_i32_0 = arith.constant 0 : i32
    %c0_i32_1 = arith.constant 0 : i32
    return %arg0, %c0_i32, %c0_i32_0 : i32, i32, i32
  }
  func.func @transform_3(%arg0: i32, %arg1: i32, %arg2: i32) -> (i32, i32, i32) {
    %c0_i32 = arith.constant 0 : i32
    %c0_i32_0 = arith.constant 0 : i32
    %c0_i32_1 = arith.constant 0 : i32
    return %arg0, %c0_i32, %c0_i32_0 : i32, i32, i32
  }
  func.func @transform_4(%arg0: i32, %arg1: i32, %arg2: i32) -> (i32, i32, i32) {
    %c0_i32 = arith.constant 0 : i32
    %c0_i32_0 = arith.constant 0 : i32
    %c0_i32_1 = arith.constant 0 : i32
    return %arg0, %c0_i32, %c0_i32_0 : i32, i32, i32
  }
  func.func @transform_5(%arg0: i32, %arg1: i32, %arg2: i32) -> (i32, i32, i32) {
    %c0_i32 = arith.constant 0 : i32
    %c0_i32_0 = arith.constant 0 : i32
    return %arg0, %arg1, %c0_i32 : i32, i32, i32
  }
}

</mosaic_0001>

<bundles_post_ra>
// kernel: custom-call.8
= control target key start
LH: loop header
LB: loop body
LE: loop exit
PB: predicated region body
PF: predicated region fallthrough
CT: control target
= control target key end

     0   :  { %s6_s0 = inlined_call_operand.vmem [shape: f32[2,64], index: 0, kind: output, shape index: {}]  }

// kernel: pointnet_sa_forward.1
= control target key start
LH: loop header
LB: loop body
LE: loop exit
PB: predicated region body
PF: predicated region fallthrough
CT: control target
= control target key end

     0   :  { %s1753_s0 = inlined_call_operand.hbm [shape: bf16[2,8,32,7], index: 0, kind: input, shape index: {}]   ;;  %s1754_s1 = inlined_call_operand.hbm [shape: bf16[2,7,16], index: 1, kind: input, shape index: {}]   ;;  %s1755_s2 = inlined_call_operand.hbm [shape: f32[2,1,16], index: 2, kind: input, shape index: {}]   ;;  %s1756_s3 = inlined_call_operand.hbm [shape: bf16[2,16,32], index: 3, kind: input, shape index: {}]   ;;  %s1757_s4 = inlined_call_operand.hbm [shape: f32[2,1,32], index: 4, kind: input, shape index: {}]   ;;  %s1758_s5 = inlined_call_operand.hbm [shape: f32[2,32,32], index: 5, kind: output, shape index: {}]  }
   0x1   :  { %1785 = sst [smem:[#allocation31_spill]] %s1754_s1 }
   0x2   :  { %1786 = sst [smem:[#allocation32_spill]] %s1756_s3 }
   0x3   :  { %1787 = sst [smem:[#allocation33_spill]] %s1758_s5 }
   0x4   :  { %10 = vsyncpa [#allocation4], 0 }
   0x5   :  { %12 = vsyncpa [#allocation4 + $0x1], 0 }
   0x6   :  { %13 = vsyncpa [#allocation7], 0 }
   0x7   :  { %15 = vsyncpa [#allocation7 + $0x1], 0 }
   0x8   :  { %16 = vsyncpa [#allocation10], 0 }
   0x9   :  { %18 = vsyncpa [#allocation10 + $0x1], 0 }
   0xa   :  { %19 = vsyncpa [#allocation5], 0 }
   0xb   :  { %21 = vsyncpa [#allocation5 + $0x1], 0  ;;  %s1320_s18 = smov 0   ;;  %s1322_s19 = smov 0  }
   0xc   :  { %s1324_s20 = smov 0   ;;  %s1326_s21 = smov 0  }
   0xd   :  { %s1328_s22 = smov 0   ;;  %s1330_s23 = smov 0  }
   0xe   :  { %s1332_s24 = smov 0   ;;  %s1334_s25 = smov 0  }
   0xf   :  { %s1336_s26 = smov 0   ;;  %s1338_s27 = smov 0  }
  0x10   :  { %s1340_s28 = smov 0  }
  0x11 LB: > { %1788 = sst [smem:[#allocation17_spill]] %s1237_s18  ;;  %s1376_s29 = sadd.s32 4294967295, %s1277_s28   ;;  %s1277_s28 = sphi %s1340_s28, %s27_s28   ;;  %s1273_s27 = sphi %s1338_s27, %s1855_s27   ;;  %s1269_s26 = sphi %s1336_s26, %s1848_s26   ;;  %s1265_s25 = sphi %s1334_s25, %s1854_s25   ;;  %s1261_s24 = sphi %s1332_s24, %s1853_s24   ;;  %s1257_s23 = sphi %s1330_s23, %s1852_s23   ;;  %s1253_s22 = sphi %s1328_s22, %s1851_s22   ;;  %s1249_s21 = sphi %s1326_s21, %s1846_s21   ;;  %s1245_s20 = sphi %s1324_s20, %s1850_s20   ;;  %s1241_s19 = sphi %s1322_s19, %s1849_s19   ;;  %s1237_s18 = sphi %s1320_s18, %s1845_s18  }
  0x12   : > { %1789 = sst [smem:[#allocation18_spill]] %s1241_s19  ;;  %s811_s30 = sadd.s32 4294967294, %s1277_s28  }
  0x13   : > { %1790 = sst [smem:[#allocation19_spill]] %s1253_s22  ;;  %p1764_p0 = scmp.eq.s32.totalorder %s1277_s28, 0 }
  0x14   : > { %1791 = sst [smem:[#allocation20_spill]] %s1261_s24  ;;  %p1763_p1 = scmp.eq.s32.totalorder %s1376_s29, 0 }
  0x15   : > { %1792 = sst [smem:[#allocation21_spill]] %s1265_s25  ;;  %p90_p2 = scmp.ne.s32.totalorder %s1245_s20, %s1241_s19 }
  0x16   : > { %1793 = sst [smem:[#allocation22_spill]] %s1269_s26  ;;  %p96_p3 = scmp.ne.s32.totalorder %s1241_s19, %s1237_s18 }
  0x17   : > { %1794 = sst [smem:[#allocation23_spill]] %s1376_s29  ;;  %p200_p4 = scmp.eq.s32.totalorder %s1376_s29, 15 }
  0x18   : > { %p1389_p5 = por %p90_p2, %p1764_p0  ;;  %p206_p6 = scmp.eq.s32.totalorder %s811_s30, 15 }
  0x19   : > { %p1395_p7 = por %p96_p3, %p1763_p1  ;;  %p1399_p8 = por %p200_p4, %p90_p2 }
  0x1a   : > { %p1403_p9 = por %p206_p6, %p96_p3  ;;  %p1762_p10 = scmp.lt.s32.totalorder %s1277_s28, 16 }
  0x1b   : > { %s1796_s8 = scalar_select %p1395_p7, 1, 0 }
  0x1c   : > { %s1798_s9 = scalar_select %p1399_p8, 1, 0 }
  0x1d   : > { %1797 = sst [smem:[#allocation24_spill]] %s1796_s8  ;;  %s1410_s12 = sand.u32 1, %s1245_s20  }
  0x1e   : > { %1799 = sst [smem:[#allocation25_spill]] %s1798_s9  ;;  %s818_s13 = sshll.u32 %s1410_s12, 2 }
  0x1f   : > { %s1800_s10 = scalar_select %p1403_p9, 1, 0 }
  0x20   : > { %s819_s14 = sshll.u32 %s1273_s27, 6  ;;  %s1802_s1 = sld [smem:[#allocation31_spill]] }
  0x21   : > { %1801 = sst [smem:[#allocation26_spill]] %s1800_s10  ;;  %s255_s30 = scalar_lea.vmem [#allocation6], %s818_s13 }
  0x22   : > { %s262_s6 = sshll.u32 %s255_s30, 4  ;;  %p1423_p11 = pnand %p1762_p10, %p1389_p5  ;;  %s1427_s6 = int_to_ptr.vmem [resolvable:$true] %s262_s6 }
  0x23   : > { %s1804_s10 = sand.u32 1, %s1277_s28  }
  0x24   : > { %s1803_s11 = scalar_select %p1423_p11, 1, 0 }
  0x25   : > { %s1432_s15 = scalar_lea.sflag [#allocation7], %s1804_s10  ;;  %p1438_p2 = pneg %p1423_p11 }
  0x26   : > { %s1417_s17 = scalar_lea.hbm %s1802_s1, %s819_s14  ;;  %s1002_s30 = scalar_lea.hbm %s1802_s1, 128 }
  0x27   : > { %s997_s14 = scalar_lea.hbm %s1417_s17, 64  ;;  %p1003_p5 = scmp.lt.u32.totalorder %s1417_s17, %s1802_s1 }
  0x28   : > { %p998_p13 = scmp.ne.s32.totalorder %s1417_s17, %s997_s14  ;;  %p1004_p6 = scmp.lt.u32.totalorder %s1002_s30, %s997_s14 }
  0x29   : > { %p1006_p1 = scmp.lt.u32.totalorder %s997_s14, %s1417_s17 }
  0x2a   : > { %p1000_p3 = pnand %p1438_p2, %p998_p13  ;;  %p1005_p10 = por %p1004_p6, %p1003_p5 }
  0x2c   : > { %p1001_p4 = pneg %p1000_p3  ;;  %p1007_p0 = por %p1006_p1, %p1005_p10 }
  0x2e   : > { %p1008_p12 = pnand %p1007_p0, %p1001_p4 }
  0x30   : > { %1011 = shalt.err (!%p1008_p12)
}
  0x31   : > { %s1012_s10 = scalar_lea.vmem %s1427_s6, 64  ;;  %s1279_s7 = smov [#allocation6]  }
  0x32   : > { %p1013_p13 = scmp.ne.s32.totalorder %s1427_s6, %s1012_s10  ;;  %s1017_s13 = sshll.u32 %s1279_s7, 4  ;;  %s1018_s13 = int_to_ptr.vmem [resolvable:$false] %s1017_s13 }
  0x33   : > { %s1019_s5 = scalar_lea.vmem %s1018_s13, 128  ;;  %p1020_p8 = scmp.lt.s32.totalorder %s1427_s6, %s1018_s13 }
  0x34   : > { %p1015_p3 = pnand %p1013_p13, %p1438_p2  ;;  %p1021_p7 = scmp.lt.s32.totalorder %s1019_s5, %s1012_s10 }
  0x36   : > { %p1016_p9 = pneg %p1015_p3  ;;  %p1022_p5 = por %p1021_p7, %p1020_p8 }
  0x38   : > { %p1023_p6 = pnand %p1022_p5, %p1016_p9 }
  0x3a   : > { %1026 = shalt.err (!%p1023_p6)
}
  0x3b   : > { %885 = dma.hbm_to_vmem [thread:$0]  (!%p1423_p11), %s1417_s17, 64, %s1427_s6, %s1432_s15  }
  0x3c   : > { %p322_p0 = scmp.lt.s32.totalorder %s1277_s28, 17  ;;  %s821_s18 = sshll.u32 %s1410_s12, 3 }
  0x3d   : > { %p1806_p1 = scmp.ge.s32.totalorder %s1277_s28, 1  ;;  %s847_s30 = sshll.u32 %s1273_s27, 7 }
  0x3e   : > { %s290_s10 = scalar_lea.vmem [#allocation9], %s821_s18  ;;  %s1809_s3 = sld [smem:[#allocation32_spill]] }
  0x3f   : > { %p1466_p10 = pnand %p1806_p1, %p322_p0  ;;  %s297_s7 = sshll.u32 %s290_s10, 4  ;;  %s1476_s7 = int_to_ptr.vmem [resolvable:$true] %s297_s7 }
  0x40   : > { %s1810_s6 = sand.u32 1, %s1277_s28  }
  0x41   : > { %s1807_s14 = scalar_select %p1466_p10, 1, 0 }
  0x42   : > { %s1480_s17 = scalar_lea.sflag [#allocation10], %s1810_s6 }
  0x43   : > { %1808 = sst [smem:[#allocation27_spill]] %s1807_s14 }
  0x44   : > { %s1474_s1 = scalar_lea.hbm %s1809_s3, %s847_s30  ;;  %1811 = sst [smem:[#allocation28_spill]] %s1480_s17 }
  0x45   : > { %s1027_s9 = scalar_lea.hbm %s1474_s1, 128  ;;  %s1032_s13 = scalar_lea.hbm %s1809_s3, 256 }
  0x46   : > { %p1028_p7 = scmp.ne.s32.totalorder %s1474_s1, %s1027_s9  ;;  %p1033_p12 = scmp.lt.u32.totalorder %s1474_s1, %s1809_s3 }
  0x47   : > { %p1034_p4 = scmp.lt.u32.totalorder %s1032_s13, %s1027_s9  ;;  %p1036_p3 = scmp.lt.u32.totalorder %s1027_s9, %s1474_s1 }
  0x48   : > { %p1030_p8 = pnand %p1028_p7, %p1438_p2 }
  0x49   : > { %p1035_p13 = por %p1034_p4, %p1033_p12 }
  0x4a   : > { %p1031_p9 = pneg %p1030_p8 }
  0x4b   : > { %p1037_p5 = por %p1036_p3, %p1035_p13 }
  0x4d   : > { %p1038_p6 = pnand %p1037_p5, %p1031_p9 }
  0x4f   : > { %1041 = shalt.err (!%p1038_p6)
}
  0x50   : > { %s1042_s6 = scalar_lea.vmem %s1476_s7, 128  ;;  %s1280_s18 = smov [#allocation9]  }
  0x51   : > { %p1043_p0 = scmp.ne.s32.totalorder %s1476_s7, %s1042_s6  ;;  %s1047_s10 = sshll.u32 %s1280_s18, 4  ;;  %s1048_s10 = int_to_ptr.vmem [resolvable:$false] %s1047_s10 }
  0x52   : > { %s1049_s30 = scalar_lea.vmem %s1048_s10, 256  ;;  %p1050_p8 = scmp.lt.s32.totalorder %s1476_s7, %s1048_s10 }
  0x53   : > { %p1045_p1 = pnand %p1043_p0, %p1438_p2  ;;  %p1051_p10 = scmp.lt.s32.totalorder %s1049_s30, %s1042_s6 }
  0x55   : > { %p1046_p7 = pneg %p1045_p1  ;;  %p1052_p12 = por %p1051_p10, %p1050_p8 }
  0x57   : > { %p1053_p4 = pnand %p1052_p12, %p1046_p7 }
  0x59   : > { %1056 = shalt.err (!%p1053_p4)
}
  0x5a   : > { %s1769_s9 = smov 64   ;;  %s1770_s13 = smov 4  }
  0x5b   : > { %891 = dma.hbm_to_vmem [thread:$0]  (!%p1423_p11), %s1474_s1, 128, %s1476_s7, %s1480_s17, %s1769_s9, %s1769_s9, %s1770_s13  }
  0x5c   : > { %s39_s5 = sadd.s32 1, %s1269_s26  ;;  %s46_s6 = sadd.s32 1, %s1273_s27 }
  0x5d   : > { %p40_p10 = scmp.ge.s32.totalorder %s39_s5, 8  ;;  %s57_s18 = sadd.s32 1, %s1257_s23 }
  0x5e   : > { %p64_p9 = scmp.ne.s32.totalorder %s1257_s23, %s1253_s22  ;;  %p70_p13 = scmp.ne.s32.totalorder %s1253_s22, %s1249_s21 }
  0x5f   : > { %s1857_s5 = smov (%p40_p10, %s39_s5), 0  ;;  %s1859_s6 = smov (!%p40_p10, %s46_s6), %s1273_s27 }
  0x60   : > { %1812 = sst [smem:[#allocation29_spill]] %s1857_s5  ;;  %s51_s10 = ssub.s32 %s1269_s26, %s1857_s5 }
  0x61   : > { %p1813_p3 = scmp.eq.s32.totalorder %s1277_s28, 0  ;;  %p48_p6 = scmp.ge.s32.totalorder %s1859_s6, 2 }
  0x62   : > { %p1815_p0 = scmp.eq.s32.totalorder %s1376_s29, 0  ;;  %s226_s21 = sand.u32 1, %s1257_s23  }
  0x63   : > { %p1521_p5 = por %p1813_p3, %p64_p9  ;;  %s815_s7 = sshll.u32 %s1269_s26, 2 }
  0x64   : > { %p1527_p1 = por %p1815_p0, %p70_p13  ;;  %s1861_s6 = smov (%p48_p6, %s1859_s6), 0 }
  0x65   : > { %s814_s9 = sshll.u32 %s226_s21, 4  ;;  %s50_s13 = ssub.s32 %s1273_s27, %s1861_s6 }
  0x66   : > { %s1816_s1 = scalar_select %p1527_p1, 1, 0 }
  0x67   : > { %s52_s3 = sor.u32 %s51_s10, %s50_s13  ;;  %p81_p7 = scmp.eq.s32.totalorder %s50_s13, 0 }
  0x68   : > { %1817 = sst [smem:[#allocation30_spill]] %s1816_s1  ;;  %p55_p8 = scmp.eq.s32.totalorder %s52_s3, 0 }
  0x69   : > { %s816_s5 = sshll.u32 %s1273_s27, 5  ;;  %s1818_s25 = sadd.s32 1, %s1245_s20 }
  0x6a   : > { %s1541_s24 = scalar_select %p81_p7, %s1245_s20, %s1818_s25  }
  0x6b   : > { %s1544_s8 = scalar_select %p55_p8, %s1257_s23, %s57_s18  }
  0x6c   : > { %s238_s19 = sadd.s32 %s816_s5, %s815_s7  ;;  %s230_s26 = scalar_lea.vmem [#allocation3], %s814_s9 }
  0x6d   : > { %s241_s29 = sshll.u32 %s230_s26, 4  ;;  %s817_s1 = sshll.u32 %s238_s19, 6  ;;  %s1546_s29 = int_to_ptr.vmem [resolvable:$true] %s241_s29 }
  0x6e   : > { %s1551_s17 = scalar_lea.hbm %s1753_s0, %s817_s1  ;;  %p1819_p12 = scmp.lt.s32.totalorder %s1277_s28, 16 }
  0x6f   : > { %s820_s19 = sshll.u32 %s1273_s27, 4  ;;  %s1569_s14 = scalar_lea.sflag [#allocation4], %s226_s21 }
  0x70   : > { %p1557_p4 = pnand %p1819_p12, %p1521_p5  ;;  %s1567_s22 = scalar_lea.hbm %s1755_s2, %s820_s19 }
  0x71   : > { %s1057_s9 = scalar_lea.hbm %s1551_s17, 256  ;;  %s1062_s18 = scalar_lea.hbm %s1753_s0, 4096 }
  0x72   : > { %p1058_p10 = scmp.ne.s32.totalorder %s1551_s17, %s1057_s9  ;;  %p1059_p9 = pneg %p1557_p4 }
  0x73   : > { %p1063_p5 = scmp.lt.u32.totalorder %s1551_s17, %s1753_s0  ;;  %p1064_p6 = scmp.lt.u32.totalorder %s1062_s18, %s1057_s9 }
  0x74   : > { %p1060_p13 = pnand %p1059_p9, %p1058_p10  ;;  %p1066_p7 = scmp.lt.u32.totalorder %s1057_s9, %s1551_s17 }
  0x75   : > { %p1065_p0 = por %p1064_p6, %p1063_p5 }
  0x76   : > { %p1061_p3 = pneg %p1060_p13 }
  0x77   : > { %p1067_p8 = por %p1066_p7, %p1065_p0 }
  0x79   : > { %p1068_p12 = pnand %p1067_p8, %p1061_p3 }
  0x7b   : > { %1071 = shalt.err (!%p1068_p12)
}
  0x7c   : > { %s1072_s1 = scalar_lea.vmem %s1546_s29, 256  ;;  %s1283_s21 = smov [#allocation3]  }
  0x7d   : > { %p1073_p10 = scmp.ne.s32.totalorder %s1546_s29, %s1072_s1  ;;  %s1077_s7 = sshll.u32 %s1283_s21, 4  ;;  %s1078_s7 = int_to_ptr.vmem [resolvable:$false] %s1077_s7 }
  0x7e   : > { %s1079_s25 = scalar_lea.vmem %s1078_s7, 512  ;;  %p1080_p11 = scmp.lt.s32.totalorder %s1546_s29, %s1078_s7 }
  0x7f   : > { %p1075_p13 = pnand %p1073_p10, %p1059_p9  ;;  %p1081_p5 = scmp.lt.s32.totalorder %s1079_s25, %s1072_s1 }
  0x81   : > { %p1076_p1 = pneg %p1075_p13  ;;  %p1082_p6 = por %p1081_p5, %p1080_p11 }
  0x83   : > { %p1083_p0 = pnand %p1082_p6, %p1076_p1 }
  0x85   : > { %1086 = shalt.err (!%p1083_p0)
}
  0x86   : > { %s1821_s26 = smov 4   ;;  %s1822_s9 = smov 64  }
  0x87   : > { %882 = dma.hbm_to_vmem [thread:$0]  (!%p1557_p4), %s1551_s17, 256, %s1546_s29, %s1569_s14, %s1822_s9, %s1822_s9, %s1821_s26  }
  0x88   : > { %s272_s13 = scalar_lea.vmem [#allocation8], %s1410_s12  ;;  %s1606_s10 = scalar_lea.hbm %s1757_s4, %s820_s19 }
  0x89   : > { %s279_s5 = sshll.u32 %s272_s13, 4  ;;  %s1087_s30 = scalar_lea.hbm %s1567_s22, 16  ;;  %s280_s5 = int_to_ptr.vmem [resolvable:$true] %s279_s5 }
  0x8a   : > { %p1088_p11 = scmp.ne.s32.totalorder %s1567_s22, %s1087_s30  ;;  %s1092_s7 = scalar_lea.hbm %s1755_s2, 32 }
  0x8b   : > { %p1093_p4 = scmp.lt.u32.totalorder %s1567_s22, %s1755_s2  ;;  %p1094_p3 = scmp.lt.u32.totalorder %s1092_s7, %s1087_s30 }
  0x8c   : > { %p1090_p1 = pnand %p1088_p11, %p1438_p2  ;;  %p1096_p8 = scmp.lt.u32.totalorder %s1087_s30, %s1567_s22 }
  0x8d   : > { %p1095_p7 = por %p1094_p3, %p1093_p4 }
  0x8e   : > { %p1091_p9 = pneg %p1090_p1 }
  0x8f   : > { %p1097_p12 = por %p1096_p8, %p1095_p7 }
  0x91   : > { %p1098_p10 = pnand %p1097_p12, %p1091_p9 }
  0x93   : > { %1101 = shalt.err (!%p1098_p10)
}
  0x94   : > { %s1102_s17 = scalar_lea.vmem %s280_s5, 16  ;;  %s1284_s19 = smov [#allocation8]  }
  0x95   : > { %p1103_p13 = scmp.ne.s32.totalorder %s280_s5, %s1102_s17  ;;  %s1107_s14 = sshll.u32 %s1284_s19, 4  ;;  %s1108_s14 = int_to_ptr.vmem [resolvable:$false] %s1107_s14 }
  0x96   : > { %s1109_s26 = scalar_lea.vmem %s1108_s14, 32  ;;  %p1110_p0 = scmp.lt.s32.totalorder %s280_s5, %s1108_s14 }
  0x97   : > { %p1105_p5 = pnand %p1103_p13, %p1438_p2  ;;  %p1111_p11 = scmp.lt.s32.totalorder %s1109_s26, %s1102_s17 }
  0x99   : > { %p1106_p6 = pneg %p1105_p5  ;;  %p1112_p1 = por %p1111_p11, %p1110_p0 }
  0x9b   : > { %p1113_p3 = pnand %p1112_p1, %p1106_p6 }
  0x9d   : > { %1116 = shalt.err (!%p1113_p3)
}
  0x9e   : > { %p1823_p4 = scmp.ne.s32.totalorder %s1803_s11, 0  ;;  %s310_s9 = scalar_lea.vmem [#allocation11], %s1410_s12 }
  0x9f   : > { %s317_s13 = sshll.u32 %s310_s9, 4  ;;  %s1117_s18 = scalar_lea.hbm %s1606_s10, 16  ;;  %s318_s13 = int_to_ptr.vmem [resolvable:$true] %s317_s13 }
  0xa0   : > { %888 = dma.hbm_to_vmem [thread:$0]  (!%p1823_p4), %s1567_s22, 16, %s280_s5, %s1432_s15  }
  0xa1   : > { %p1118_p9 = scmp.ne.s32.totalorder %s1606_s10, %s1117_s18  ;;  %s1122_s1 = scalar_lea.hbm %s1757_s4, 32 }
  0xa2   : > { %p1123_p12 = scmp.lt.u32.totalorder %s1606_s10, %s1757_s4  ;;  %p1124_p10 = scmp.lt.u32.totalorder %s1122_s1, %s1117_s18 }
  0xa3   : > { %p1120_p7 = pnand %p1118_p9, %p1438_p2  ;;  %p1126_p5 = scmp.lt.u32.totalorder %s1117_s18, %s1606_s10 }
  0xa4   : > { %p1125_p13 = por %p1124_p10, %p1123_p12 }
  0xa5   : > { %p1121_p8 = pneg %p1120_p7 }
  0xa6   : > { %p1127_p6 = por %p1126_p5, %p1125_p13 }
  0xa8   : > { %p1128_p0 = pnand %p1127_p6, %p1121_p8 }
  0xaa   : > { %1131 = shalt.err (!%p1128_p0)
}
  0xab   : > { %s1132_s12 = scalar_lea.vmem %s318_s13, 16  ;;  %s1285_s15 = smov [#allocation11]  }
  0xac   : > { %p1133_p11 = scmp.ne.s32.totalorder %s318_s13, %s1132_s12  ;;  %s1137_s22 = sshll.u32 %s1285_s15, 4  ;;  %s1138_s22 = int_to_ptr.vmem [resolvable:$false] %s1137_s22 }
  0xad   : > { %s1139_s5 = scalar_lea.vmem %s1138_s22, 32  ;;  %p1140_p9 = scmp.lt.s32.totalorder %s318_s13, %s1138_s22 }
  0xae   : > { %p1135_p1 = pnand %p1133_p11, %p1438_p2  ;;  %p1141_p7 = scmp.lt.s32.totalorder %s1139_s5, %s1132_s12 }
  0xb0   : > { %p1136_p3 = pneg %p1135_p1  ;;  %p1142_p4 = por %p1141_p7, %p1140_p9 }
  0xb2   : > { %p1143_p10 = pnand %p1142_p4, %p1136_p3 }
  0xb4   : > { %1146 = shalt.err (!%p1143_p10)
}
  0xb5   : > { %p1824_p12 = scmp.ne.s32.totalorder %s1803_s11, 0  ;;  %s1825_s25 = sld [smem:[#allocation28_spill]] }
  0xb6   : > { %s1826_s29 = sld [smem:[#allocation27_spill]] }
  0xbb   : > { %894 = dma.hbm_to_vmem [thread:$0]  (!%p1824_p12), %s1606_s10, 16, %s318_s13, %s1825_s25  }
  0xbc   : > { %p1827_p8 = scmp.ne.s32.totalorder %s1826_s29, 0 }
  0xbd   : > { %s1828_s16 = sld [smem:[#allocation19_spill]] (!%p1827_p8)  ;;  %s1829_s17 = sld [smem:[#allocation30_spill]] (!%p1827_p8) }
  0xbe   : > { %326 = sbr.rel (%p1827_p8) target bundleno = 722 (0x2d2), region = 40 }
  0xc3   : > { %s328_s19 = sand.u32 (!%p1827_p8), 1, %s1828_s16   ;;  %p1830_p2 = scmp.ne.s32.totalorder (!%p1827_p8), %s1829_s17, 0 }
  0xc4   : > { %s1648_s14 = sshll.u32 (!%p1827_p8), %s328_s19, 4  ;;  %s329_s26 = scalar_lea.sflag (!%p1827_p8), [#allocation4], %s328_s19 }
  0xc5   : > { %s332_s9 = scalar_lea.vmem [#allocation3], %s1648_s14 }
  0xc6   : > { %1220 = dma.done.wait (%p1830_p2), %s329_s26, 256  }
  0xc7   : > { %1222 = vsyncadd (%p1830_p2), %s329_s26, 4294967040  ;;  %s1831_s11 = sld [smem:[#allocation23_spill]]  ;;  %s1832_s18 = sld [smem:[#allocation18_spill]] }
  0xc8   : > { %s1833_s3 = sld [smem:[#allocation24_spill]] }
  0xcd   : > { %s337_s10 = sand.u32 1, %s1831_s11   ;;  %s1657_s13 = sand.u32 1, %s1832_s18  }
  0xce   : > { %s827_s30 = sshll.u32 %s1657_s13, 2  ;;  %s338_s1 = scalar_lea.sflag [#allocation7], %s337_s10 }
  0xcf   : > { %s341_s21 = scalar_lea.vmem [#allocation6], %s827_s30  ;;  %p1834_p4 = scmp.ne.s32.totalorder %s1833_s3, 0 }
  0xd1   : > { %1224 = dma.done.wait (%p1834_p4), %s338_s1, 80  }
  0xd2   : > { %1226 = vsyncadd (%p1834_p4), %s338_s1, 4294967216  ;;  %s828_s7 = sshll.u32 %s1657_s13, 3  ;;  %s349_s12 = scalar_lea.vmem [#allocation8], %s1657_s13 }
  0xd3   : > { %s355_s15 = scalar_lea.sflag [#allocation10], %s337_s10  ;;  %s358_s22 = scalar_lea.vmem [#allocation9], %s828_s7 }
  0xd4   : > { %1228 = dma.done.wait (%p1834_p4), %s355_s15, 144  }
  0xd5   : > { %1230 = vsyncadd (%p1834_p4), %s355_s15, 4294967152  ;;  %s829_s5 = sshll.u32 %s1657_s13, 5  ;;  %vm443_vm0 = vcmask 1042432   ;;  %vm444_vm1 = vcmask 1043456   ;;  %v1286_v0 = vmov 65535   ;;  %vm436_vm2 = vcmask 56320  }
  0xd6   : > { %v445_v1 = vsel %vm443_vm0, 4294967295, %v1286_v0  ;;  %v418_v3 = vld [vmem:[%s341_s21] sm:$0xf]  ;;  %v995_v6 = vld [vmem:[%s332_s9 + $0x8] sm:$0xff]   ;;  %vm520_vm3 = vcmask 130048   ;;  %s366_s25 = scalar_lea.vmem [#allocation11], %s1657_s13 }
  0xd7   : > { %v446_v2 = vsel %vm444_vm1, %v445_v1, 0  ;;  %v994_v5 = vld [vmem:[%s332_s9] sm:$0xff]   ;;  %s1674_s29 = scalar_lea.vmem [#allocation12], %s829_s5  ;;  %s1835_s16 = sld [smem:[#allocation20_spill]] }
  0xd8   : > { %v448_v4 = vand.u32 %v446_v2, %v418_v3  ;;  %857 = vmatprep.mubr.msk.bf16.mxu0 %vm436_vm2, %v994_v5  ;;  %v996_v7 = vld [vmem:[%s358_s22] sm:$0xff]   ;;  %v830_v8 = vld [vmem:[%s349_s12] ss:$0 sm:$0xff] }
  0xd9   : > { %861 = vmatprep.subr.bf16.mxu1 %v996_v7  ;;  %v835_v23 = vld [vmem:[%s366_s25] ss:$0 sm:$0xff] }
  0xda   : > { %855 = vmatprep.subr.bf16.mxu0 %v448_v4  ;;  %862 = vmatpush3.bf16.msra.mxu1 %v996_v7 }
  0xdb   : > { %856 = vmatpush3.bf16.msra.mxu0 %v448_v4 }
  0xdd   : > { %p839_p13 = scmp.ne.s32.totalorder %s1835_s16, 0 }
  0xde   : > { %858 = vmatmul.mubr.msk.bf16.vlgmr.msra.gmra.mrb[0].mxu0 %vm436_vm2, %v995_v6  ;;  %vm584_vm4 = vcmask (!%p839_p13), 261120  }
 0x1b1   : > { %v859_v9 = vpop.f32.mrb[0].mxu0 }
 0x1b2   : > { %v493_v10 = vadd.f32 %v859_v9, %v830_v8  ;;  %v484_v11 = vpop.f32.mrb[1].mxu0 }
 0x1b3   : > { %v485_v12 = vadd.f32 %v830_v8, %v484_v11  ;;  %v860_v13 = vpop.f32.mrb[2].mxu0 }
 0x1b4   : > { %v496_v14 = vadd.f32 %v860_v13, %v830_v8  ;;  %v487_v15 = vpop.f32.mrb[3].mxu0  ;;  %v501_v17 = vmax.f32 %v493_v10, 0.0 }
 0x1b5   : > { %v488_v16 = vadd.f32 %v830_v8, %v487_v15  ;;  %v499_v19 = vmax.f32 %v485_v12, 0.0 }
 0x1b6   : > { %v502_v18 = vmax.f32 %v496_v14, 0.0 }
 0x1b7   : > { %v500_v20 = vmax.f32 %v488_v16, 0.0 }
 0x1b8   : > { %v504_v21 = vpack.c.bf16 %v502_v18, %v501_v17 }
 0x1b9   : > { %v503_v22 = vpack.c.bf16 %v500_v20, %v499_v19 }
 0x1bb   : > { %863 = vmatprep.mubr.msk.bf16.mxu1 %vm520_vm3, %v503_v22 }
 0x1bc   : > { %864 = vmatmul.mubr.msk.bf16.vlgmr.msra.gmra.mrb[0].mxu1 %vm520_vm3, %v504_v21 }
 0x28f   : > { %v865_v24 = vpop.f32.mrb[0].mxu1  ;;  %583 = sbr.rel (%p839_p13) target bundleno = 664 (0x298), region = 64 }
 0x290   : > { %v570_v25 = vadd.f32 %v865_v24, %v835_v23  ;;  %v561_v26 = vpop.f32.mrb[1].mxu1 }
 0x291   : > { %v562_v27 = vadd.f32 %v835_v23, %v561_v26  ;;  %v866_v28 = vpop.f32.mrb[2].mxu1 }
 0x292   : > { %v578_v29 = vmax.f32 %v570_v25, 0.0  ;;  %v573_v30 = vadd.f32 %v866_v28, %v835_v23  ;;  %v564_v31 = vpop.f32.mrb[3].mxu1 }
 0x293   : > { %v576_v32 = vmax.f32 %v562_v27, 0.0  ;;  %v565_v33 = vadd.f32 %v835_v23, %v564_v31 }
 0x294   : > { %v579_v34 = vmax.f32 %v573_v30, 0.0  ;;  %587 = vst.msk [vmem:[#allocation2 + $0x10] sm:$0xff] (!%p839_p13), %vm584_vm4, %v578_v29 }
 0x295   : > { %v577_v35 = vmax.f32 %v565_v33, 0.0  ;;  %585 = vst.msk [vmem:[#allocation2] sm:$0xff] (!%p839_p13), %vm584_vm4, %v576_v32 }
 0x296   : > { %588 = vst.msk [vmem:[#allocation2 + $0x18] sm:$0xff] %vm584_vm4, %v579_v34 }
 0x297   : > { %586 = vst.msk [vmem:[#allocation2 + $0x8] sm:$0xff] %vm584_vm4, %v577_v35 }
 0x298 PF: > { %s1836_s17 = sld [smem:[#allocation20_spill]] }
 0x29e   : > { %p840_p5 = scmp.le.s32.totalorder %s1836_s17, 0 }
 0x29f   : > { %v593_v36 = vld [vmem:[#allocation2] sm:$0xff] (!%p840_p5)  ;;  %vm601_vm5 = vcmask (!%p840_p5), 261120   ;;  %v594_v37 = vld [vmem:[#allocation2 + $0x8] sm:$0xff] (!%p840_p5)  ;;  %v595_v38 = vld [vmem:[#allocation2 + $0x10] sm:$0xff] (!%p840_p5) }
 0x2a0   : > { %592 = sbr.rel (%p840_p5) target bundleno = 679 (0x2a7), region = 68  ;;  %v597_v39 = vmax.f32 (!%p840_p5), %v593_v36, %v576_v32  ;;  %v598_v40 = vmax.f32 (!%p840_p5), %v594_v37, %v577_v35  ;;  %v599_v41 = vmax.f32 (!%p840_p5), %v595_v38, %v578_v29  ;;  %v596_v42 = vld [vmem:[#allocation2 + $0x18] sm:$0xff] (!%p840_p5) }
 0x2a1   : > { %v600_v43 = vmax.f32 (!%p840_p5), %v596_v42, %v579_v34 }
 0x2a2   : > { %602 = vst.msk [vmem:[#allocation2] sm:$0xff] (!%p840_p5), %vm601_vm5, %v597_v39  ;;  %603 = vst.msk [vmem:[#allocation2 + $0x8] sm:$0xff] (!%p840_p5), %vm601_vm5, %v598_v40 }
 0x2a3   : > { %604 = vst.msk [vmem:[#allocation2 + $0x10] sm:$0xff] (!%p840_p5), %vm601_vm5, %v599_v41  ;;  %605 = vst.msk [vmem:[#allocation2 + $0x18] sm:$0xff] (!%p840_p5), %vm601_vm5, %v600_v43 }
 0x2a7 PF: > { %s1837_s19 = sld [smem:[#allocation20_spill]] }
 0x2ad   : > { %p841_p6 = scmp.ne.s32.totalorder %s1837_s19, 7 }
 0x2ae   : > { %v610_v44 = vld [vmem:[#allocation2] sm:$0xff] (!%p841_p6)  ;;  %vm614_vm6 = vcmask (!%p841_p6), 261120   ;;  %v611_v45 = vld [vmem:[#allocation2 + $0x8] sm:$0xff] (!%p841_p6)  ;;  %v612_v46 = vld [vmem:[#allocation2 + $0x10] sm:$0xff] (!%p841_p6) }
 0x2af   : > { %609 = sbr.rel (%p841_p6) target bundleno = 694 (0x2b6), region = 72  ;;  %615 = vst.msk [vmem:[%s1674_s29] sm:$0xff] (!%p841_p6), %vm614_vm6, %v610_v44  ;;  %616 = vst.msk [vmem:[%s1674_s29 + $0x8] sm:$0xff] (!%p841_p6), %vm614_vm6, %v611_v45  ;;  %v613_v47 = vld [vmem:[#allocation2 + $0x18] sm:$0xff] (!%p841_p6) }
 0x2b0   : > { %617 = vst.msk [vmem:[%s1674_s29 + $0x10] sm:$0xff] (!%p841_p6), %vm614_vm6, %v612_v46  ;;  %618 = vst.msk [vmem:[%s1674_s29 + $0x18] sm:$0xff] (!%p841_p6), %vm614_vm6, %v613_v47 }
 0x2b6 PF: > { %s1838_s14 = sld [smem:[#allocation21_spill]]  ;;  %s1839_s26 = sld [smem:[#allocation25_spill]] }
 0x2b7   : > { %s1840_s3 = sld [smem:[#allocation33_spill]]  ;;  %s635_s30 = sshll.u32 %s1674_s29, 4  ;;  %s1690_s30 = int_to_ptr.vmem [resolvable:$true] %s635_s30 }
 0x2b8   : > { %s620_s1 = scalar_lea.sflag [#allocation5], %s1657_s13  ;;  %s1147_s21 = scalar_lea.vmem %s1690_s30, 512 }
 0x2b9   : > { %p1148_p0 = scmp.ne.s32.totalorder %s1690_s30, %s1147_s21  ;;  %s1287_s7 = smov [#allocation12]  }
 0x2ba   : > { %s1151_s12 = sshll.u32 %s1287_s7, 4  ;;  %s1152_s12 = int_to_ptr.vmem [resolvable:$false] %s1151_s12 }
 0x2bb   : > { %s1153_s15 = scalar_lea.vmem %s1152_s12, 1024  ;;  %p1154_p9 = scmp.lt.s32.totalorder %s1690_s30, %s1152_s12 }
 0x2bc   : > { %s848_s9 = sshll.u32 %s1838_s14, 9  ;;  %p1841_p11 = scmp.ne.s32.totalorder %s1839_s26, 0 }
 0x2bd   : > { %s1687_s10 = scalar_lea.hbm %s1840_s3, %s848_s9  ;;  %p1155_p7 = scmp.lt.s32.totalorder %s1153_s15, %s1147_s21 }
 0x2be   : > { %p1149_p1 = pnand %p1148_p0, %p1841_p11 }
 0x2bf   : > { %p1156_p10 = por %p1155_p7, %p1154_p9 }
 0x2c0   : > { %p1150_p3 = pneg %p1149_p1 }
 0x2c2   : > { %p1157_p12 = pnand %p1156_p10, %p1150_p3 }
 0x2c4   : > { %1160 = shalt.err (!%p1157_p12)
}
 0x2c5   : > { %s1161_s22 = scalar_lea.hbm %s1687_s10, 512  ;;  %s1165_s29 = scalar_lea.hbm %s1840_s3, 1024 }
 0x2c6   : > { %p1162_p8 = scmp.ne.s32.totalorder %s1687_s10, %s1161_s22  ;;  %p1166_p13 = scmp.lt.u32.totalorder %s1687_s10, %s1840_s3 }
 0x2c7   : > { %p1167_p5 = scmp.lt.u32.totalorder %s1165_s29, %s1161_s22  ;;  %p1169_p0 = scmp.lt.u32.totalorder %s1161_s22, %s1687_s10 }
 0x2c8   : > { %p1163_p2 = pnand %p1162_p8, %p1841_p11 }
 0x2c9   : > { %p1168_p6 = por %p1167_p5, %p1166_p13 }
 0x2ca   : > { %p1164_p4 = pneg %p1163_p2 }
 0x2cb   : > { %p1170_p1 = por %p1169_p0, %p1168_p6 }
 0x2cd   : > { %p1171_p3 = pnand %p1170_p1, %p1164_p4 }
 0x2cf   : > { %1174 = shalt.err (!%p1171_p3)
}
 0x2d0   : > { %s1288_s19 = smov 128   ;;  %s1289_s14 = smov 8  }
 0x2d1   : > { %877 = dma.vmem_to_hbm [thread:$0]  (%p1841_p11), %s1690_s30, 512, %s1687_s10, %s620_s1, %s1288_s19, %s1288_s19, %s1289_s14  }
 0x2d2 PF: > { %s1842_s9 = sld [smem:[#allocation17_spill]]  ;;  %s1843_s11 = sld [smem:[#allocation26_spill]] }
 0x2d3   : > { %p900_p9 = scmp.ge.s32.totalorder %s1277_s28, 2 }
 0x2d8   : > { %s650_s18 = sand.u32 1, %s1842_s9   ;;  %p1844_p7 = scmp.ne.s32.totalorder %s1843_s11, 0 }
 0x2d9   : > { %s651_s21 = scalar_lea.sflag [#allocation5], %s650_s18 }
 0x2da   : > { %p896_p10 = pnand %p900_p9, %p1844_p7 }
 0x2dc   : > { %1232 = dma.done.wait (!%p896_p10), %s651_s21, 512  }
 0x2dd   : > { %1234 = vsyncadd (!%p896_p10), %s651_s21, 4294966784  ;;  %s27_s28 = sadd.s32 1, %s1277_s28   ;;  %s1845_s18 = sld [smem:[#allocation18_spill]] }
 0x2de   : > { %p24_p12 = scmp.ge.s32.totalorder %s27_s28, 18   ;;  %s1846_s21 = sld [smem:[#allocation19_spill]] }
 0x2df   : > { %s1847_s13 = sld [smem:[#allocation22_spill]]  ;;  %s1848_s26 = sld [smem:[#allocation29_spill]] }
 0x2e0   : > { %s1849_s19 = smov %s1245_s20  ;;  %s1850_s20 = smov %s1541_s24 }
 0x2e1   : > { %s1851_s22 = smov %s1257_s23  ;;  %s1852_s23 = smov %s1544_s8 }
 0x2e2   : > { %s1854_s25 = smov %s1273_s27  ;;  %s1855_s27 = smov %s1861_s6 }
 0x2e3   :  { %26 = sbr.rel (!%p24_p12) target bundleno = 17 (0x11), region = 145 }
 0x2e5   : > { %s1853_s24 = smov %s1847_s13 }
 0x2ea   :  { %656 = vsyncpa [#allocation4], 1 }
 0x2eb   :  { %658 = vsyncpa [#allocation4 + $0x1], 1 }
 0x2ec   :  { %659 = vsyncpa [#allocation7], 1 }
 0x2ed   :  { %661 = vsyncpa [#allocation7 + $0x1], 1 }
 0x2ee   :  { %662 = vsyncpa [#allocation10], 1 }
 0x2ef   :  { %664 = vsyncpa [#allocation10 + $0x1], 1 }
 0x2f0   :  { %665 = vsyncpa [#allocation5], 1 }
 0x2f1   :  { %667 = vsyncpa [#allocation5 + $0x1], 1 }

</bundles_post_ra>
